<compile_context>
chip_gen: v6e
topology: v6e:2x2x1
jax: 0.10.0
libtpu: 0.0.40
codegen_flags: <defaults>
</compile_context>

<pallas_src>
import functools

import jax
import jax.numpy as jnp
from jax import lax
from jax.experimental import pallas as pl
from jax.experimental.pallas import tpu as pltpu

_MIB = 1024 * 1024
_CHUNK_BYTES = 2 * _MIB          # target f32 bytes per in-kernel hw chunk (fused path)


def _cdiv(a, b):
    return -(-a // b)


def _tpu_caps():
    """Generation-aware sizing.  v5e/v6e have 128 MiB VMEM; v7x only 64 MiB."""
    try:
        vmem = int(getattr(pltpu.get_tpu_info(), "vmem_capacity_bytes", 0))
    except Exception:
        vmem = 0
    if vmem >= 96 * _MIB:                              # v5e / v6e
        return {"vmem_limit": 96 * _MIB,
                "fused_threshold": 16 * _MIB,
                "tile_budget": 8 * _MIB}
    # v7x (64 MiB physical VMEM) or unknown chip: conservative sizing.
    return {"vmem_limit": 48 * _MIB,
            "fused_threshold": 8 * _MIB,
            "tile_budget": 4 * _MIB}


def _chan_partials(x_f32):
    """(tn, C, L) f32 -> per-channel (1, C, 1) sum and sum-of-squares.

    The batch axis is reduced first (cheap VPU adds) so only a single
    cross-lane (XLU) reduction per quantity is issued per tile."""
    xs = jnp.sum(x_f32, axis=0, keepdims=True)
    xq = jnp.sum(x_f32 * x_f32, axis=0, keepdims=True)
    return (jnp.sum(xs, axis=2, keepdims=True),
            jnp.sum(xq, axis=2, keepdims=True))


# ---------------------------------------------------------------------------
# Single-pass fused kernel: whole (N, C, HW) slab resident in VMEM.
# Stats + normalize both stream over hw chunks so f32 temporaries stay small.
# ---------------------------------------------------------------------------
def _fused_bn_kernel(x_ref, g_ref, b_ref, o_ref, sum_sc, sq_sc,
                     *, inv_m, eps, chunk, n_full, tail):
    hw = x_ref.shape[2]
    aligned = (chunk % 128 == 0)

    # ---- pass A (VMEM-resident): per-channel sum / sumsq -------------------
    if chunk == hw:                       # small slab: one piece, no loop
        s, q = _chan_partials(x_ref[...].astype(jnp.float32))
        sum_sc[...] = s
        sq_sc[...] = q
    else:                                 # stream hw chunks; temps ~chunk-sized
        sum_sc[...] = jnp.zeros_like(sum_sc)
        sq_sc[...] = jnp.zeros_like(sq_sc)

        def stats_body(ci, carry):
            off = ci * chunk
            if aligned:
                off = pl.multiple_of(off, 128)
            xb = x_ref[:, :, pl.ds(off, chunk)].astype(jnp.float32)
            s, q = _chan_partials(xb)
            sum_sc[...] += s
            sq_sc[...] += q
            return carry
        lax.fori_loop(0, n_full, stats_body, 0)

        if tail > 0:                      # static tail (hw not multiple of chunk)
            off0 = n_full * chunk
            xb = x_ref[:, :, off0:off0 + tail].astype(jnp.float32)
            s, q = _chan_partials(xb)
            sum_sc[...] += s
            sq_sc[...] += q

    # ---- fold stats into per-channel scale / shift --------------------------
    mean = sum_sc[...] * inv_m
    # TODO(synk): E[x^2]-E[x]^2 can lose precision when |mean| >> std; clamp
    # prevents NaN but a Welford-style pass would be more robust.
    var = jnp.maximum(sq_sc[...] * inv_m - mean * mean, 0.0)
    inv_std = lax.rsqrt(var + eps)
    scale = g_ref[...] * inv_std                               # (1, C, 1)
    shift = b_ref[...] - mean * scale

    # ---- pass B (VMEM-resident): normalize + affine -------------------------
    if chunk == hw:
        o_ref[...] = (x_ref[...].astype(jnp.float32) * scale + shift).astype(o_ref.dtype)
    else:
        def norm_body(ci, carry):
            off = ci * chunk
            if aligned:
                off = pl.multiple_of(off, 128)
            xb = x_ref[:, :, pl.ds(off, chunk)].astype(jnp.float32)
            o_ref[:, :, pl.ds(off, chunk)] = (xb * scale + shift).astype(o_ref.dtype)
            return carry
        lax.fori_loop(0, n_full, norm_body, 0)

        if tail > 0:
            off0 = n_full * chunk
            xb = x_ref[:, :, off0:off0 + tail].astype(jnp.float32)
            o_ref[:, :, off0:off0 + tail] = (xb * scale + shift).astype(o_ref.dtype)


# ---------------------------------------------------------------------------
# Tiled pass 1: partial per-channel sum / sumsq.
# grid = (nb batch blocks [parallel], hp hw groups [parallel], gr steps [arbitrary]).
# Ragged hw tails and duplicated blocks from the hw split are masked out.
# ---------------------------------------------------------------------------
def _stats_kernel(x_ref, sum_ref, sq_ref, *, hw, thw, split, hp, need_mask):
    k = pl.program_id(2)

    @pl.when(k == 0)
    def _():
        sum_ref[...] = jnp.zeros_like(sum_ref)
        sq_ref[...] = jnp.zeros_like(sq_ref)

    x = x_ref[...].astype(jnp.float32)
    if need_mask:
        j = pl.program_id(1)
        blk = j * split + k                               # hw-block index this step
        lane = lax.broadcasted_iota(jnp.int32, x.shape, 2)
        ok = (blk * thw + lane) < hw                      # ragged tail of last block
        # Groups j < hp-1 only own blocks [j*split, j*split+split); any extra
        # step would duplicate a block owned by the last group -> zero it.
        ok = ok & ((j == hp - 1) | (k < split))
        x = jnp.where(ok, x, 0.0)

    s, q = _chan_partials(x)
    sum_ref[...] += s
    sq_ref[...] += q


# ---------------------------------------------------------------------------
# Tiled pass 2: pure lane-dense FMA stream (scale/shift precomputed in jnp).
# ---------------------------------------------------------------------------
def _norm_kernel(x_ref, scale_ref, shift_ref, o_ref):
    x = x_ref[...].astype(jnp.float32)
    o_ref[...] = (x * scale_ref[...] + shift_ref[...]).astype(o_ref.dtype)


def _pick_tiles(n, c, hw, tile_budget):
    """Choose (tn, thw) so one f32 x-tile is close to tile_budget.

    tn always divides n.  thw is either the full hw (lane-dense, no masking
    needed) or a multiple of 128 (ragged tail handled by masking / clipped
    output writes), so tiles never balloon past the budget."""
    bpe = 4
    per_sample = c * hw * bpe
    if per_sample <= tile_budget:
        thw = hw
        tn = max(1, min(n, tile_budget // per_sample))
        while n % tn != 0:
            tn -= 1
        # Prefer >= 2 batch blocks (v7x megacore) while tiles stay large.
        if tn == n and n % 2 == 0 and per_sample * (n // 2) >= 512 * 1024:
            tn = n // 2
    else:
        tn = 1
        lanes = max(128, (tile_budget // (c * bpe)) // 128 * 128)
        thw = hw if lanes >= hw else lanes
        # Note: for extreme channel counts (c*512 bytes > budget) the tile can
        # exceed the budget; a channel grid axis would be needed (not expected
        # for slimmable-net channel counts).
    return tn, thw


def switchable_batchnorm2d_forward(x_nchw, gamma, beta, *, eps=1e-5,
                                   force_tiled=False,
                                   _tile_budget=None, _chunk_bytes=None):
    """Training-mode BatchNorm2d (the bn[idx=0] branch of SwitchableBatchNorm2d)."""
    n, c, h, w = x_nchw.shape
    assert gamma.shape == (c,) and beta.shape == (c,)
    hw = h * w
    inv_m = 1.0 / float(n * hw)

    caps = _tpu_caps()
    tile_budget = _tile_budget if _tile_budget is not None else caps["tile_budget"]
    chunk_bytes = _chunk_bytes if _chunk_bytes is not None else _CHUNK_BYTES
    vmem_limit = caps["vmem_limit"]

    x3d = x_nchw.reshape(n, c, hw)                 # free view of native NCHW
    g3d = gamma.reshape(1, c, 1).astype(jnp.float32)
    b3d = beta.reshape(1, c, 1).astype(jnp.float32)
    # Note: when C is below the sublane quantum (e.g. the demo's C=4) vregs are
    # partially empty; irrelevant for real slimmable-net channel counts (>=32).

    slab_f32 = n * c * hw * 4
    if slab_f32 <= caps["fused_threshold"] and not force_tiled:
        # ------------- single-pass fused path: 1 read + 1 write of x --------
        if slab_f32 <= chunk_bytes or hw < 256:
            chunk, n_full, tail = hw, 1, 0
        else:
            chunk = min(max(128, (chunk_bytes // (n * c * 4)) // 128 * 128),
                        (hw // 128) * 128)
            n_full = hw // chunk
            tail = hw - n_full * chunk
        y3d = pl.pallas_call(
            functools.partial(_fused_bn_kernel, inv_m=inv_m, eps=eps,
                              chunk=chunk, n_full=n_full, tail=tail),
            out_shape=jax.ShapeDtypeStruct((n, c, hw), x3d.dtype),
            grid_spec=pltpu.PrefetchScalarGridSpec(
                num_scalar_prefetch=0,
                grid=(1,),
                in_specs=[pl.BlockSpec((n, c, hw), lambda i: (0, 0, 0)),
                          pl.BlockSpec((1, c, 1), lambda i: (0, 0, 0)),
                          pl.BlockSpec((1, c, 1), lambda i: (0, 0, 0))],
                out_specs=pl.BlockSpec((n, c, hw), lambda i: (0, 0, 0)),
                scratch_shapes=[pltpu.VMEM((1, c, 1), jnp.float32),
                                pltpu.VMEM((1, c, 1), jnp.float32)]),
            compiler_params=pltpu.CompilerParams(
                dimension_semantics=("arbitrary",),
                vmem_limit_bytes=vmem_limit),
        )(x3d, g3d, b3d)
        return y3d.reshape(n, c, h, w)

    # ------------------------- two-pass tiled path ---------------------------
    tn, thw = _pick_tiles(n, c, hw, tile_budget)
    nb = n // tn
    g_all = _cdiv(hw, thw)                     # total hw blocks
    # v7x megacore: give pass 1 a second parallel axis when there is only one
    # batch block; pass 2 is already fully parallel.
    hp = 2 if (nb == 1 and g_all >= 2) else 1
    gr = _cdiv(g_all, hp)                      # reduction steps per parallel group
    split = g_all - gr                         # first group owns blocks [0, split)
    need_mask = (hw % thw != 0) or (hp * gr != g_all)

    # pass 1: per-(batch block, hw group) per-channel partial sum / sumsq
    p_sum, p_sq = pl.pallas_call(
        functools.partial(_stats_kernel, hw=hw, thw=thw, split=split, hp=hp,
                          need_mask=need_mask),
        out_shape=(jax.ShapeDtypeStruct((nb * hp, c, 1), jnp.float32),
                   jax.ShapeDtypeStruct((nb * hp, c, 1), jnp.float32)),
        grid_spec=pltpu.PrefetchScalarGridSpec(
            num_scalar_prefetch=0,
            grid=(nb, hp, gr),
            in_specs=[pl.BlockSpec((tn, c, thw),
                                   lambda i, j, k: (i, 0, j * split + k))],
            out_specs=[pl.BlockSpec((1, c, 1), lambda i, j, k: (i * hp + j, 0, 0)),
                       pl.BlockSpec((1, c, 1), lambda i, j, k: (i * hp + j, 0, 0))],
        ),
        compiler_params=pltpu.CompilerParams(
            dimension_semantics=("parallel", "parallel", "arbitrary"),
            vmem_limit_bytes=vmem_limit),
    )(x3d)

    # Tiny partial combine + rsqrt + scale/shift hoisted out of the kernels.
    tot_sum = jnp.sum(p_sum, axis=0)                       # (c, 1)
    tot_sq = jnp.sum(p_sq, axis=0)
    mean = tot_sum * inv_m
    var = jnp.maximum(tot_sq * inv_m - mean * mean, 0.0)   # clamp cancellation
    inv_std = lax.rsqrt(var + eps)
    scale = (g3d[0] * inv_std).reshape(1, c, 1)
    shift = (b3d[0] - mean * scale[0]).reshape(1, c, 1)

    # pass 2: normalize + affine -- pure lane-dense FMA stream, fully parallel
    y3d = pl.pallas_call(
        _norm_kernel,
        out_shape=jax.ShapeDtypeStruct((n, c, hw), x3d.dtype),
        grid_spec=pltpu.PrefetchScalarGridSpec(
            num_scalar_prefetch=0,
            grid=(nb, g_all),
            in_specs=[pl.BlockSpec((tn, c, thw), lambda i, j: (i, 0, j)),
                      pl.BlockSpec((1, c, 1), lambda i, j: (0, 0, 0)),
                      pl.BlockSpec((1, c, 1), lambda i, j: (0, 0, 0))],
            out_specs=pl.BlockSpec((tn, c, thw), lambda i, j: (i, 0, j)),
        ),
        compiler_params=pltpu.CompilerParams(
            dimension_semantics=("parallel", "parallel"),
            vmem_limit_bytes=vmem_limit),
    )(x3d, scale, shift)

    return y3d.reshape(n, c, h, w)


if __name__ == "__main__":
    def ref_bn(x, gamma, beta, eps=1e-5):
        mean = jnp.mean(x, axis=(0, 2, 3), keepdims=True)
        var = jnp.mean((x - mean) ** 2, axis=(0, 2, 3), keepdims=True)
        c = x.shape[1]
        return ((x - mean) / jnp.sqrt(var + eps) * gamma.reshape(1, c, 1, 1)
                + beta.reshape(1, c, 1, 1))

    # Module config: num_features_list with idx = 0 selected (width_mult = 1.0).
    num_features_list = [4, 3, 2, 1]
    c = num_features_list[0]                  # = 4 channels used by forward
    n, h, w = 2, 16, 16

    key = jax.random.PRNGKey(0)
    kx, kg, kb = jax.random.split(key, 3)
    x = jax.random.normal(kx, (n, c, h, w), dtype=jnp.float32)
    gamma = 1.0 + 0.1 * jax.random.normal(kg, (c,), dtype=jnp.float32)
    beta = 0.1 * jax.random.normal(kb, (c,), dtype=jnp.float32)
    ref = ref_bn(x, gamma, beta)

    # 1) fused single-pass path (default for this small input)
    y_fused = jax.block_until_ready(switchable_batchnorm2d_forward(x, gamma, beta))
    # 2) tiled two-pass path (taken for large inputs); forced for coverage
    y_tiled = jax.block_until_ready(
        switchable_batchnorm2d_forward(x, gamma, beta, force_tiled=True))

    assert y_fused.shape == x.shape and y_fused.dtype == x.dtype
    assert jnp.max(jnp.abs(y_fused - ref)) < 1e-4, "fused path mismatch vs reference"
    assert jnp.max(jnp.abs(y_tiled - ref)) < 1e-4, "tiled path mismatch vs reference"

    # Second config exercises the chunked fused loop (with a ragged tail) and
    # the ragged/megacore-split tiled path, via tiny forced budgets.
    c2, n2, h2, w2 = 8, 1, 20, 20
    x2 = jax.random.normal(jax.random.PRNGKey(1), (n2, c2, h2, w2), dtype=jnp.float32)
    g2 = 1.0 + 0.05 * jax.random.normal(jax.random.PRNGKey(2), (c2,), dtype=jnp.float32)
    b2 = 0.05 * jax.random.normal(jax.random.PRNGKey(3), (c2,), dtype=jnp.float32)
    ref2 = ref_bn(x2, g2, b2)

    # 3) fused path with in-kernel hw chunking + static tail
    y2_fused = jax.block_until_ready(
        switchable_batchnorm2d_forward(x2, g2, b2, _chunk_bytes=4096))
    # 4) tiled path with 128-wide ragged hw tiles + parallel hw split for pass 1
    y2_tiled = jax.block_until_ready(
        switchable_batchnorm2d_forward(x2, g2, b2, force_tiled=True,
                                       _tile_budget=4096))

    assert jnp.max(jnp.abs(y2_fused - ref2)) < 1e-4, "chunked fused path mismatch"
    assert jnp.max(jnp.abs(y2_tiled - ref2)) < 1e-4, "ragged tiled path mismatch"

    print("KERNEL_OK")
</pallas_src>

<mosaic_0001>
module attributes {stable_mosaic.version = 11 : i64} {
  func.func @_fused_bn_kernel(%arg0: i32, %arg1: memref<2x4x256xf32, #tpu.memory_space<vmem>>, %arg2: memref<1x4x1xf32, #tpu.memory_space<vmem>>, %arg3: memref<1x4x1xf32, #tpu.memory_space<vmem>>, %arg4: memref<2x4x256xf32, #tpu.memory_space<vmem>>, %arg5: memref<1x4x1xf32, #tpu.memory_space<vmem>>, %arg6: memref<1x4x1xf32, #tpu.memory_space<vmem>>) attributes {dimension_semantics = [#tpu.dimension_semantics<arbitrary>], iteration_bounds = array<i64: 1>, scalar_prefetch = 0 : i64, scratch_operands = 2 : i64, tpu.core_type = #tpu.core_type<tc>, window_params = [{pipeline_mode = #tpu.pipeline_mode<synchronous>, transform_indices = @transform_0, window_bounds = array<i64: 2, 4, 256>}, {pipeline_mode = #tpu.pipeline_mode<synchronous>, transform_indices = @transform_1, window_bounds = array<i64: 1, 4, 1>}, {pipeline_mode = #tpu.pipeline_mode<synchronous>, transform_indices = @transform_2, window_bounds = array<i64: 1, 4, 1>}, {pipeline_mode = #tpu.pipeline_mode<synchronous>, transform_indices = @transform_3, window_bounds = array<i64: 2, 4, 256>}]} {
    %c0 = arith.constant 0 : index
    %c0_0 = arith.constant 0 : index
    %c0_1 = arith.constant 0 : index
    %0 = vector.load %arg1[%c0, %c0_0, %c0_1] : memref<2x4x256xf32, #tpu.memory_space<vmem>>, vector<2x4x256xf32>
    %cst = arith.constant dense<0.000000e+00> : vector<4x256xf32>
    %1 = vector.multi_reduction <add>, %0, %cst [0] : vector<2x4x256xf32> to vector<4x256xf32>
    %2 = vector.shape_cast %1 : vector<4x256xf32> to vector<1x4x256xf32>
    %3 = arith.mulf %0, %0 : vector<2x4x256xf32>
    %cst_2 = arith.constant dense<0.000000e+00> : vector<4x256xf32>
    %4 = vector.multi_reduction <add>, %3, %cst_2 [0] : vector<2x4x256xf32> to vector<4x256xf32>
    %5 = vector.shape_cast %4 : vector<4x256xf32> to vector<1x4x256xf32>
    %cst_3 = arith.constant dense<0.000000e+00> : vector<1x4xf32>
    %6 = vector.multi_reduction <add>, %2, %cst_3 [2] : vector<1x4x256xf32> to vector<1x4xf32>
    %7 = vector.shape_cast %6 : vector<1x4xf32> to vector<1x4x1xf32>
    %cst_4 = arith.constant dense<0.000000e+00> : vector<1x4xf32>
    %8 = vector.multi_reduction <add>, %5, %cst_4 [2] : vector<1x4x256xf32> to vector<1x4xf32>
    %9 = vector.shape_cast %8 : vector<1x4xf32> to vector<1x4x1xf32>
    %c0_5 = arith.constant 0 : index
    %c0_6 = arith.constant 0 : index
    %c0_7 = arith.constant 0 : index
    %10 = vector.load %arg5[%c0_5, %c0_6, %c0_7] : memref<1x4x1xf32, #tpu.memory_space<vmem>>, vector<1x4x1xf32>
    tpu.vector_store %arg5[%c0_5, %c0_6, %c0_7], %7 {strides = array<i32>} : memref<1x4x1xf32, #tpu.memory_space<vmem>>, vector<1x4x1xf32>,
    %c0_8 = arith.constant 0 : index
    %c0_9 = arith.constant 0 : index
    %c0_10 = arith.constant 0 : index
    %11 = vector.load %arg6[%c0_8, %c0_9, %c0_10] : memref<1x4x1xf32, #tpu.memory_space<vmem>>, vector<1x4x1xf32>
    tpu.vector_store %arg6[%c0_8, %c0_9, %c0_10], %9 {strides = array<i32>} : memref<1x4x1xf32, #tpu.memory_space<vmem>>, vector<1x4x1xf32>,
    %c0_11 = arith.constant 0 : index
    %c0_12 = arith.constant 0 : index
    %c0_13 = arith.constant 0 : index
    %12 = vector.load %arg5[%c0_11, %c0_12, %c0_13] : memref<1x4x1xf32, #tpu.memory_space<vmem>>, vector<1x4x1xf32>
    %cst_14 = arith.constant 0.001953125 : f32
    %13 = vector.broadcast %cst_14 : f32 to vector<1x4x1xf32>
    %14 = arith.mulf %12, %13 : vector<1x4x1xf32>
    %c0_15 = arith.constant 0 : index
    %c0_16 = arith.constant 0 : index
    %c0_17 = arith.constant 0 : index
    %15 = vector.load %arg6[%c0_15, %c0_16, %c0_17] : memref<1x4x1xf32, #tpu.memory_space<vmem>>, vector<1x4x1xf32>
    %cst_18 = arith.constant 0.001953125 : f32
    %16 = vector.broadcast %cst_18 : f32 to vector<1x4x1xf32>
    %17 = arith.mulf %15, %16 : vector<1x4x1xf32>
    %18 = arith.mulf %14, %14 : vector<1x4x1xf32>
    %19 = arith.subf %17, %18 : vector<1x4x1xf32>
    %cst_19 = arith.constant 0.000000e+00 : f32
    %20 = vector.broadcast %cst_19 : f32 to vector<1x4x1xf32>
    %21 = arith.maximumf %19, %20 : vector<1x4x1xf32>
    %cst_20 = arith.constant 9.99999974E-6 : f32
    %22 = vector.broadcast %cst_20 : f32 to vector<1x4x1xf32>
    %23 = arith.addf %21, %22 : vector<1x4x1xf32>
    %24 = math.rsqrt %23 : vector<1x4x1xf32>
    %c0_21 = arith.constant 0 : index
    %c0_22 = arith.constant 0 : index
    %c0_23 = arith.constant 0 : index
    %25 = vector.load %arg2[%c0_21, %c0_22, %c0_23] : memref<1x4x1xf32, #tpu.memory_space<vmem>>, vector<1x4x1xf32>
    %26 = arith.mulf %25, %24 : vector<1x4x1xf32>
    %c0_24 = arith.constant 0 : index
    %c0_25 = arith.constant 0 : index
    %c0_26 = arith.constant 0 : index
    %27 = vector.load %arg3[%c0_24, %c0_25, %c0_26] : memref<1x4x1xf32, #tpu.memory_space<vmem>>, vector<1x4x1xf32>
    %28 = arith.mulf %14, %26 : vector<1x4x1xf32>
    %29 = arith.subf %27, %28 : vector<1x4x1xf32>
    %c0_27 = arith.constant 0 : index
    %c0_28 = arith.constant 0 : index
    %c0_29 = arith.constant 0 : index
    %30 = vector.load %arg1[%c0_27, %c0_28, %c0_29] : memref<2x4x256xf32, #tpu.memory_space<vmem>>, vector<2x4x256xf32>
    %31 = vector.broadcast %26 : vector<1x4x1xf32> to vector<2x4x256xf32>
    %32 = arith.mulf %30, %31 : vector<2x4x256xf32>
    %33 = vector.broadcast %29 : vector<1x4x1xf32> to vector<2x4x256xf32>
    %34 = arith.addf %32, %33 : vector<2x4x256xf32>
    %c0_30 = arith.constant 0 : index
    %c0_31 = arith.constant 0 : index
    %c0_32 = arith.constant 0 : index
    %35 = vector.load %arg4[%c0_30, %c0_31, %c0_32] : memref<2x4x256xf32, #tpu.memory_space<vmem>>, vector<2x4x256xf32>
    tpu.vector_store %arg4[%c0_30, %c0_31, %c0_32], %34 {strides = array<i32>} : memref<2x4x256xf32, #tpu.memory_space<vmem>>, vector<2x4x256xf32>,
    return
  }
  func.func @transform_0(%arg0: i32) -> (i32, i32, i32) {
    %c0_i32 = arith.constant 0 : i32
    %c0_i32_0 = arith.constant 0 : i32
    %c0_i32_1 = arith.constant 0 : i32
    %c0_i32_2 = arith.constant 0 : i32
    return %c0_i32, %c0_i32_0, %c0_i32_1 : i32, i32, i32
  }
  func.func @transform_1(%arg0: i32) -> (i32, i32, i32) {
    %c0_i32 = arith.constant 0 : i32
    %c0_i32_0 = arith.constant 0 : i32
    %c0_i32_1 = arith.constant 0 : i32
    %c0_i32_2 = arith.constant 0 : i32
    return %c0_i32, %c0_i32_0, %c0_i32_1 : i32, i32, i32
  }
  func.func @transform_2(%arg0: i32) -> (i32, i32, i32) {
    %c0_i32 = arith.constant 0 : i32
    %c0_i32_0 = arith.constant 0 : i32
    %c0_i32_1 = arith.constant 0 : i32
    %c0_i32_2 = arith.constant 0 : i32
    return %c0_i32, %c0_i32_0, %c0_i32_1 : i32, i32, i32
  }
  func.func @transform_3(%arg0: i32) -> (i32, i32, i32) {
    %c0_i32 = arith.constant 0 : i32
    %c0_i32_0 = arith.constant 0 : i32
    %c0_i32_1 = arith.constant 0 : i32
    %c0_i32_2 = arith.constant 0 : i32
    return %c0_i32, %c0_i32_0, %c0_i32_1 : i32, i32, i32
  }
}

</mosaic_0001>

<bundles_post_ra>
// kernel: tpu_custom_call.1
= control target key start
LH: loop header
LB: loop body
LE: loop exit
PB: predicated region body
PF: predicated region fallthrough
CT: control target
= control target key end

     0   :  { %8 = vsyncpa [#allocation5], 0  ;;  %s262_s0 = inlined_call_operand.hbm [shape: f32[2,4,256], index: 0, kind: input, shape index: {}]   ;;  %s263_s1 = inlined_call_operand.vmem [shape: f32[1,4,1], index: 1, kind: input, shape index: {}]   ;;  %s264_s2 = inlined_call_operand.vmem [shape: f32[1,4,1], index: 2, kind: input, shape index: {}]   ;;  %s265_s3 = inlined_call_operand.hbm [shape: f32[2,4,256], index: 3, kind: output, shape index: {}]  }
   0x1   :  { %9 = vsyncpa [#allocation6], 0  ;;  %s190_s12 = smov [#allocation4]  }
   0x2   :  { %s15_s13 = sshll.u32 %s190_s12, 4  ;;  %s16_s13 = int_to_ptr.vmem [resolvable:$true] %s15_s13 }
   0x3   :  { %s154_s14 = scalar_lea.vmem %s16_s13, 256  ;;  %p159_p1 = scmp.lt.s32.totalorder %s16_s13, %s16_s13 }
   0x4   :  { %p155_p0 = scmp.ne.s32.totalorder %s16_s13, %s154_s14  ;;  %p160_p2 = scmp.lt.s32.totalorder %s154_s14, %s154_s14 }
   0x6   :  { %p161_p3 = por %p160_p2, %p159_p1 }
   0x8   :  { %p162_p4 = pnand %p161_p3, %p155_p0 }
   0xa   :  { %165 = shalt.err (!%p162_p4)
}
   0xb   :  { %s191_s15 = smov 128   ;;  %s192_s16 = smov 8  }
   0xc   :  { %21 = dma.hbm_to_vmem [thread:$0]  %s262_s0, 256, %s16_s13, [#allocation5], %s191_s15, %s191_s15, %s192_s16  }
   0xd   :  { %186 = dma.done.wait [#allocation5], 256  }
   0xe   :  { %187 = vsyncadd [#allocation5], 4294967040  ;;  %vm37_vm0 = vcmask 1043456   ;;  %v222_v0 = vld [vmem:[#allocation4] sm:$0xff]  ;;  %v224_v1 = vld [vmem:[#allocation4 + $0x8] sm:$0xff]  ;;  %v193_v26 = vmov 0   ;;  %v94_v45 = vlaneseq }
   0xf   :  { %v33_v2 = vcombine.high %v222_v0, %v222_v0  ;;  %v34_v3 = vcombine.high %v224_v1, %v224_v1  ;;  %v38_v4 = vsel %vm37_vm0, %v222_v0, 0.0  ;;  %v39_v5 = vsel %vm37_vm0, %v224_v1, 0.0  ;;  %140 = vset.pattern.permute.xlu1 %v193_v26  ;;  %141 = vset.pattern.permute.xlu0 %v193_v26  ;;  %v80_v37 = vld [vmem:[%s263_s1] sm:$0xf]  ;;  %s195_s1 = smov [#allocation7]  }
  0x10   :  { %v40_v6 = vadd.f32 %v39_v5, %v38_v4  ;;  %v44_v7 = vmul.f32 %v222_v0, %v222_v0  ;;  %v45_v8 = vmul.f32 %v224_v1, %v224_v1  ;;  %vm68_vm1 = vcmask 3072   ;;  %v82_v40 = vld [vmem:[%s264_s2] sm:$0xf]  ;;  %s122_s22 = sshll.u32 %s195_s1, 4  ;;  %s123_s22 = int_to_ptr.vmem [resolvable:$true] %s122_s22 }
  0x11   :  { %v41_v9 = vsel %vm37_vm0, %v33_v2, 0.0  ;;  %v42_v10 = vsel %vm37_vm0, %v34_v3, 0.0  ;;  %v194_v43 = vmov 839922192   ;;  %v95_v47 = vshrl.u32 %v94_v45, 7  ;;  %s166_s2 = scalar_lea.vmem %s123_s22, 256  ;;  %p171_p6 = scmp.lt.s32.totalorder %s123_s22, %s123_s22 }
  0x12   :  { %v43_v11 = vadd.f32 %v42_v10, %v41_v9  ;;  %v58_v12 = vsel %vm37_vm0, %v40_v6, 0.0  ;;  %v48_v13 = vcombine.high %v44_v7, %v44_v7  ;;  %v49_v14 = vcombine.high %v45_v8, %v45_v8  ;;  %p167_p5 = scmp.ne.s32.totalorder %s123_s22, %s166_s2  ;;  %p172_p7 = scmp.lt.s32.totalorder %s166_s2, %s166_s2 }
  0x13   :  { %v52_v15 = vsel %vm37_vm0, %v44_v7, 0.0  ;;  %v53_v16 = vsel %vm37_vm0, %v45_v8, 0.0  ;;  %v92_v44 = vunpack.c.l.s4 %v194_v43 }
  0x14   :  { %v59_v17 = vsel %vm37_vm0, %v43_v11, 0.0  ;;  %v54_v18 = vadd.f32 %v53_v16, %v52_v15  ;;  %v55_v19 = vsel %vm37_vm0, %v48_v13, 0.0  ;;  %v56_v20 = vsel %vm37_vm0, %v49_v14, 0.0  ;;  %p173_p8 = por %p172_p7, %p171_p6 }
  0x15   :  { %v60_v21 = vadd.f32 %v59_v17, %v58_v12  ;;  %v57_v22 = vadd.f32 %v56_v20, %v55_v19  ;;  %v93_v46 = vunpack.c.0.s8 %v92_v44 }
  0x16   :  { %v63_v23 = vsel %vm37_vm0, %v54_v18, 0.0  ;;  %p174_p9 = pnand %p173_p8, %p167_p5 }
  0x17   :  { %61 = vadd.xlane.f32.xlu0 %v60_v21  ;;  %v64_v24 = vsel %vm37_vm0, %v57_v22, 0.0  ;;  %v96_v48 = vsub.s32 %v93_v46, %v95_v47 }
  0x18   :  { %v65_v25 = vadd.f32 %v64_v24, %v63_v23 }
  0x1b   :  { %66 = vadd.xlane.f32.xlu0 %v65_v25 }
  0xa0   :  { %v62_v27 = vpop.xlane.xlu0 %61 }
  0xa1   :  { %69 = vst.msk [vmem:[#allocation2] sm:$0xf] %vm68_vm1, %v62_v27 }
  0xa4   :  { %v67_v28 = vpop.xlane.xlu0 %66 }
  0xa5   :  { %70 = vst.msk [vmem:[#allocation3] sm:$0xf] %vm68_vm1, %v67_v28 }
  0xa8   :  { %v71_v29 = vld [vmem:[#allocation2] sm:$0xf] }
  0xa9   :  { %v72_v30 = vmul.f32 0.001953125, %v71_v29 }
  0xab   :  { %v75_v33 = vmul.f32 %v72_v30, %v72_v30 }
  0xac   :  { %v73_v31 = vld [vmem:[#allocation3] sm:$0xf] }
  0xad   :  { %v74_v32 = vmul.f32 0.001953125, %v73_v31 }
  0xaf   :  { %v76_v34 = vsub.f32 %v74_v32, %v75_v33 }
  0xb1   :  { %v77_v35 = vmax.f32 %v76_v34, 0.0 }
  0xb3   :  { %v78_v36 = vadd.f32 1e-05, %v77_v35 }
  0xb5   :  { %144 = vrsqrt.f32 %v78_v36 }
  0xc2   :  { %v145_v38 = vpop.eup %144 }
  0xc3   :  { %v81_v39 = vmul.f32 %v145_v38, %v80_v37 }
  0xc5   :  { %89 = vperm.xlu1 %140, %v81_v39   ;;  %v83_v41 = vmul.f32 %v81_v39, %v72_v30 }
  0xc7   :  { %v84_v42 = vsub.f32 %v82_v40, %v83_v41 }
  0xc9   :  { %103 = vperm.xlu1 %140, %v84_v42  }
 0x140   :  { %v90_v49 = vpop.permute.xlu1 %89 }
 0x141   :  { %v97_v50 = vrot.slane %v90_v49, %v96_v48 }
 0x143   :  { %v99_v52 = vmul.f32 %v97_v50, %v222_v0  ;;  %v100_v53 = vmul.f32 %v97_v50, %v224_v1 }
 0x144   :  { %v104_v51 = vpop.permute.xlu1 %103 }
 0x145   :  { %v111_v54 = vrot.slane %v104_v51, %v96_v48 }
 0x147   :  { %v113_v55 = vadd.f32 %v111_v54, %v99_v52  ;;  %v114_v56 = vadd.f32 %v111_v54, %v100_v53 }
 0x149   :  { %115 = vst [vmem:[#allocation7] sm:$0xff] %v113_v55  ;;  %116 = vst [vmem:[#allocation7 + $0x8] sm:$0xff] %v114_v56 }
 0x14a   :  { %177 = shalt.err (!%p174_p9)
}
 0x14b   :  { %128 = dma.vmem_to_hbm [thread:$0]  %s123_s22, 256, %s265_s3, [#allocation6], %s191_s15, %s191_s15, %s192_s16  }
 0x14c   :  { %188 = dma.done.wait [#allocation6], 256  }
 0x14d   :  { %189 = vsyncadd [#allocation6], 4294967040 }
 0x14e   :  { %132 = vsyncpa [#allocation5], 1 }
 0x14f   :  { %133 = vsyncpa [#allocation6], 1 }

</bundles_post_ra>
